<compile_context>
chip_gen: v6e
topology: v6e:2x2x1
jax: 0.10.0
libtpu: 0.0.40
codegen_flags: <defaults>
</compile_context>

<pallas_src>
import jax
import jax.numpy as jnp
from jax.experimental import pallas as pl
from jax.experimental.pallas import tpu as pltpu


def _round_up(x, m):
    return ((x + m - 1) // m) * m


def _make_kernel(n_valid, n_pad):
    needs_col_mask = n_pad != n_valid

    def kernel(x_ref, w_ref, recon_ref, lat_ref):
        # Fused (masked) linear: mask already folded into w_ref.  One MXU matmul,
        # f32 accumulation.
        lat = jnp.dot(x_ref[...], w_ref[...], preferred_element_type=jnp.float32)
        lat_ref[...] = lat.astype(lat_ref.dtype)      # padded cols are exact zeros

        # mean_decoder = Softmax(dim=-1): the full (padded) row is in VMEM, so a
        # single-pass softmax is exact.  Padded columns -> -inf so they drop out.
        if needs_col_mask:
            col = jax.lax.broadcasted_iota(jnp.int32, lat.shape, 1)
            lat = jnp.where(col < n_valid, lat, -jnp.inf)
        mx = jnp.max(lat, axis=-1, keepdims=True)
        e = jnp.exp(lat - mx)
        denom = jnp.sum(e, axis=-1, keepdims=True)
        # Stage e through recon_ref and normalize in place: one fewer live
        # full-width f32 temporary in the epilogue.
        recon_ref[...] = e.astype(recon_ref.dtype)
        inv = pl.reciprocal(denom, approx=True)       # EUP slot, ~1e-3 rel err
        recon_ref[...] = (recon_ref[...] * inv).astype(recon_ref.dtype)

    return kernel


def prepare_decoder_weights(w_full, mask_full, compute_dtype=jnp.bfloat16):
    """Fold the hard mask into the fused weights and pad to MXU/lane-friendly
    tiles.  Call ONCE per parameter update (hoisted out of the forward path)."""
    K, N = w_full.shape
    K_pad = _round_up(K, 128)
    N_pad = _round_up(N, 128)
    w_eff = (w_full * mask_full).astype(compute_dtype)
    if (K_pad, N_pad) != (K, N):
        w_eff = jnp.pad(w_eff, ((0, K_pad - K), (0, N_pad - N)))
    return w_eff


def masked_linear_decoder_forward(z_cat, w_eff, n_genes, *, tb=128,
                                  compute_dtype=jnp.bfloat16,
                                  out_dtype=jnp.bfloat16):
    """z_cat: (B, K) concatenated [expr | ext_m | ext | cond_one_hot].
       w_eff: (K_pad, N_pad) mask-folded, padded weights (prepare_decoder_weights).
       n_genes: true out_dim N (<= N_pad).
       Returns (recon_x, dec_latent), both (B, n_genes) in out_dtype."""
    B, K = z_cat.shape
    K_pad, N_pad = w_eff.shape
    assert K <= K_pad and n_genes <= N_pad, "weights not prepared for these dims"

    x = z_cat.astype(compute_dtype)
    if K_pad != K:
        x = jnp.pad(x, ((0, 0), (0, K_pad - K)))   # (B, K) is tiny; zeros are inert

    # Batch tiling: no explicit batch pad / output slice -- Pallas masks the
    # ragged trailing block.  When B is small, split into >=2 tiles so both
    # v7x TensorCores get work.
    if B > tb:
        tb_eff = tb
    elif B >= 16:
        tb_eff = _round_up(pl.cdiv(B, 2), 8)
    else:
        tb_eff = B                                  # single block == full batch dim
    grid_b = pl.cdiv(B, tb_eff)

    out_isz = jnp.dtype(out_dtype).itemsize
    in_isz = jnp.dtype(compute_dtype).itemsize
    vmem_bytes = (2 * tb_eff * K_pad * in_isz          # x, double-buffered
                  + K_pad * N_pad * in_isz             # weight, single-buffered
                  + 2 * 2 * tb_eff * N_pad * out_isz   # 2 outputs, double-buffered
                  + 2 * tb_eff * N_pad * 4)            # f32 epilogue temps (lat, e)
    vmem_limit = int(min(max(vmem_bytes * 5 // 4 + (2 << 20), 16 << 20), 64 << 20))

    kernel = _make_kernel(n_valid=n_genes, n_pad=N_pad)

    def run(single_buffer_weight):
        w_kwargs = {"pipeline_mode": pl.Buffered(1)} if single_buffer_weight else {}
        recon, lat = pl.pallas_call(
            kernel,
            out_shape=(jax.ShapeDtypeStruct((B, N_pad), out_dtype),
                       jax.ShapeDtypeStruct((B, N_pad), out_dtype)),
            grid_spec=pltpu.PrefetchScalarGridSpec(
                num_scalar_prefetch=0,
                grid=(grid_b,),
                in_specs=[
                    pl.BlockSpec((tb_eff, K_pad), lambda i: (i, 0)),
                    # Grid-invariant weight: DMA'd once, stays resident.
                    pl.BlockSpec((K_pad, N_pad), lambda i: (0, 0), **w_kwargs),
                ],
                out_specs=[
                    pl.BlockSpec((tb_eff, N_pad), lambda i: (i, 0)),
                    pl.BlockSpec((tb_eff, N_pad), lambda i: (i, 0)),
                ],
            ),
            compiler_params=pltpu.CompilerParams(
                dimension_semantics=("parallel",),
                vmem_limit_bytes=vmem_limit),
        )(x, w_eff)
        return jax.block_until_ready((recon, lat))

    try:
        recon, lat = run(True)
    except Exception:
        # Some Pallas builds may reject Buffered(1); the double-buffered weight
        # only costs VMEM (not bandwidth), so fall back silently.
        recon, lat = run(False)

    if N_pad != n_genes:
        # Padded columns are exact zeros; slice only because callers expect (B, N).
        recon = recon[:, :n_genes]
        lat = lat[:, :n_genes]
    return recon, lat


def build_decoder_params(key, in_dim, out_dim, n_cond, n_ext, n_ext_m):
    """Deterministic synthetic parameters, shapes per MaskedLinearDecoder.__init__.
       Weights stored already transposed to (features_in, out_dim)."""
    k_w, k_wm, k_we, k_wc, k_mask, k_emask = jax.random.split(key, 6)

    def uinit(k, fan_in, shape):
        bound = 1.0 / jnp.sqrt(jnp.float32(fan_in))
        return jax.random.uniform(k, shape, jnp.float32, -bound, bound)

    w_expr = uinit(k_w, in_dim, (in_dim, out_dim))        # expr_L (MaskedLinear, bias=False)
    w_ext_m = uinit(k_wm, n_ext_m, (n_ext_m, out_dim))    # ext_L_m (MaskedLinear, bias=False)
    w_ext = uinit(k_we, n_ext, (n_ext, out_dim))          # ext_L (Linear, bias=False)
    w_cond = uinit(k_wc, n_cond, (n_cond, out_dim))       # cond_L (Linear, bias=False)

    mask = (jax.random.uniform(k_mask, (in_dim, out_dim)) > 0.5).astype(jnp.float32)
    ext_mask = (jax.random.uniform(k_emask, (n_ext_m, out_dim)) > 0.5).astype(jnp.float32)

    # column order of z_cat: [expr | ext_m | ext | cond]
    w_full = jnp.concatenate([w_expr, w_ext_m, w_ext, w_cond], axis=0)
    mask_full = jnp.concatenate(
        [mask, ext_mask,
         jnp.ones((n_ext, out_dim), jnp.float32),
         jnp.ones((n_cond, out_dim), jnp.float32)], axis=0)
    return w_full, mask_full


if __name__ == "__main__":
    # Small shapes: latent (expr) 32, masked extension 8, unmasked extension 8,
    # 4 condition classes, 200 output genes (deliberately NOT lane-aligned, to
    # exercise the N-padding + -inf softmax-mask path), batch of 16.
    in_dim, n_ext_m, n_ext, n_cond, out_dim = 32, 8, 8, 4, 200
    B = 16

    key = jax.random.PRNGKey(0)
    k_param, k_z, k_batch = jax.random.split(key, 3)

    w_full, mask_full = build_decoder_params(
        k_param, in_dim, out_dim, n_cond, n_ext, n_ext_m)
    w_eff = prepare_decoder_weights(w_full, mask_full)   # hoisted: once per step

    # z contains [expr | ext_m | ext]; `batch` indices are one-hot encoded and
    # concatenated (as in MaskedLinearDecoder.forward with batch != None).
    z = jax.random.normal(k_z, (B, in_dim + n_ext_m + n_ext), jnp.float32)
    batch_idx = jax.random.randint(k_batch, (B,), 0, n_cond)
    batch_oh = jax.nn.one_hot(batch_idx, n_cond, dtype=jnp.float32)
    z_cat = jnp.concatenate([z, batch_oh], axis=-1)

    recon_x, dec_latent = masked_linear_decoder_forward(z_cat, w_eff, out_dim)
    recon_x = jax.block_until_ready(recon_x)
    dec_latent = jax.block_until_ready(dec_latent)
    assert recon_x.shape == (B, out_dim) and dec_latent.shape == (B, out_dim)

    # Precision-matched reference (bf16 operands, f32 accumulation).
    w_m = w_full * mask_full
    lat_bf = jnp.dot(z_cat.astype(jnp.bfloat16), w_m.astype(jnp.bfloat16),
                     preferred_element_type=jnp.float32)
    ref_recon_bf = jax.nn.softmax(lat_bf, axis=-1)
    assert jnp.allclose(dec_latent.astype(jnp.float32), lat_bf, atol=2e-2, rtol=2e-2)
    assert jnp.allclose(recon_x.astype(jnp.float32), ref_recon_bf, atol=2e-3, rtol=5e-2)

    # Loose sanity check against full-f32 math (bf16 operand / output rounding).
    lat_f32 = z_cat @ w_m
    assert jnp.allclose(dec_latent.astype(jnp.float32), lat_f32, atol=6e-2, rtol=6e-2)
    assert jnp.allclose(recon_x.astype(jnp.float32), jax.nn.softmax(lat_f32, axis=-1),
                        atol=3e-3, rtol=1e-1)
    # Softmax rows sum to ~1 -> padded (-inf masked) columns were dropped cleanly.
    assert jnp.allclose(jnp.sum(recon_x.astype(jnp.float32), axis=-1), 1.0, atol=2e-2)

    # Ragged-tail / multi-tile path: B not a multiple of the batch tile.
    B2 = 20
    z2 = jax.random.normal(jax.random.PRNGKey(1), (B2, in_dim + n_ext_m + n_ext),
                           jnp.float32)
    oh2 = jax.nn.one_hot(jnp.arange(B2) % n_cond, n_cond, dtype=jnp.float32)
    z_cat2 = jnp.concatenate([z2, oh2], axis=-1)
    recon2, lat2 = masked_linear_decoder_forward(z_cat2, w_eff, out_dim, tb=8)
    recon2 = jax.block_until_ready(recon2)
    lat2_ref = jnp.dot(z_cat2.astype(jnp.bfloat16), w_m.astype(jnp.bfloat16),
                       preferred_element_type=jnp.float32)
    assert jnp.allclose(lat2.astype(jnp.float32), lat2_ref, atol=2e-2, rtol=2e-2)
    assert jnp.allclose(recon2.astype(jnp.float32), jax.nn.softmax(lat2_ref, axis=-1),
                        atol=2e-3, rtol=5e-2)

    print("KERNEL_OK")
</pallas_src>

<mosaic_0001>
module attributes {stable_mosaic.version = 11 : i64} {
  func.func @kernel(%arg0: i32, %arg1: memref<8x128xbf16, #tpu.memory_space<vmem>>, %arg2: memref<128x256xbf16, #tpu.memory_space<vmem>>, %arg3: memref<8x256xbf16, #tpu.memory_space<vmem>>, %arg4: memref<8x256xbf16, #tpu.memory_space<vmem>>) attributes {dimension_semantics = [#tpu.dimension_semantics<parallel>], iteration_bounds = array<i64: 2>, scalar_prefetch = 0 : i64, scratch_operands = 0 : i64, tpu.core_type = #tpu.core_type<tc>, window_params = [{transform_indices = @transform_0, window_bounds = array<i64: 8, 128>}, {pipeline_mode = #tpu.pipeline_mode<synchronous>, transform_indices = @transform_1, window_bounds = array<i64: 128, 256>}, {transform_indices = @transform_2, window_bounds = array<i64: 8, 256>}, {transform_indices = @transform_3, window_bounds = array<i64: 8, 256>}]} {
    %c0 = arith.constant 0 : index
    %c0_0 = arith.constant 0 : index
    %0 = vector.load %arg1[%c0, %c0_0] : memref<8x128xbf16, #tpu.memory_space<vmem>>, vector<8x128xbf16>
    %c0_1 = arith.constant 0 : index
    %c0_2 = arith.constant 0 : index
    %1 = vector.load %arg2[%c0_1, %c0_2] : memref<128x256xbf16, #tpu.memory_space<vmem>>, vector<128x256xbf16>
    %cst = arith.constant dense<0.000000e+00> : vector<8x256xf32>
    %2 = tpu.matmul %0, %1, %cst {dimension_numbers = #tpu.dot_dimension_numbers<[1], [0], [0], [1], [0, 0, 1, 1], [], []>} : vector<8x128xbf16>, vector<128x256xbf16>, vector<8x256xf32> -> vector<8x256xf32>
    %3 = arith.truncf %2 : vector<8x256xf32> to vector<8x256xbf16>
    %c0_3 = arith.constant 0 : index
    %c0_4 = arith.constant 0 : index
    %4 = vector.load %arg4[%c0_3, %c0_4] : memref<8x256xbf16, #tpu.memory_space<vmem>>, vector<8x256xbf16>
    tpu.vector_store %arg4[%c0_3, %c0_4], %3 {strides = array<i32>} : memref<8x256xbf16, #tpu.memory_space<vmem>>, vector<8x256xbf16>,
    %5 = tpu.iota {dimensions = array<i32: 1>} : vector<8x256xi32>
    %c200_i32 = arith.constant 200 : i32
    %6 = vector.broadcast %c200_i32 : i32 to vector<8x256xi32>
    %7 = arith.cmpi slt, %5, %6 : vector<8x256xi32>
    %cst_5 = arith.constant 0xFF800000 : f32
    %8 = vector.broadcast %cst_5 : f32 to vector<8x256xf32>
    %9 = arith.select %7, %2, %8 : vector<8x256xi1>, vector<8x256xf32>
    %cst_6 = arith.constant dense<0xFF800000> : vector<8xf32>
    %10 = vector.multi_reduction <maximumf>, %9, %cst_6 [1] : vector<8x256xf32> to vector<8xf32>
    %11 = vector.shape_cast %10 : vector<8xf32> to vector<8x1xf32>
    %12 = vector.broadcast %11 : vector<8x1xf32> to vector<8x256xf32>
    %13 = arith.subf %9, %12 : vector<8x256xf32>
    %14 = math.exp %13 : vector<8x256xf32>
    %cst_7 = arith.constant dense<0.000000e+00> : vector<8xf32>
    %15 = vector.multi_reduction <add>, %14, %cst_7 [1] : vector<8x256xf32> to vector<8xf32>
    %16 = vector.shape_cast %15 : vector<8xf32> to vector<8x1xf32>
    %17 = arith.truncf %14 : vector<8x256xf32> to vector<8x256xbf16>
    %c0_8 = arith.constant 0 : index
    %c0_9 = arith.constant 0 : index
    %18 = vector.load %arg3[%c0_8, %c0_9] : memref<8x256xbf16, #tpu.memory_space<vmem>>, vector<8x256xbf16>
    tpu.vector_store %arg3[%c0_8, %c0_9], %17 {strides = array<i32>} : memref<8x256xbf16, #tpu.memory_space<vmem>>, vector<8x256xbf16>,
    %19 = tpu.reciprocal %16 {approx = true} : vector<8x1xf32> -> vector<8x1xf32>
    %c0_10 = arith.constant 0 : index
    %c0_11 = arith.constant 0 : index
    %20 = vector.load %arg3[%c0_10, %c0_11] : memref<8x256xbf16, #tpu.memory_space<vmem>>, vector<8x256xbf16>
    %21 = arith.extf %20 : vector<8x256xbf16> to vector<8x256xf32>
    %22 = vector.broadcast %19 : vector<8x1xf32> to vector<8x256xf32>
    %23 = arith.mulf %21, %22 : vector<8x256xf32>
    %24 = arith.truncf %23 : vector<8x256xf32> to vector<8x256xbf16>
    %c0_12 = arith.constant 0 : index
    %c0_13 = arith.constant 0 : index
    %25 = vector.load %arg3[%c0_12, %c0_13] : memref<8x256xbf16, #tpu.memory_space<vmem>>, vector<8x256xbf16>
    tpu.vector_store %arg3[%c0_12, %c0_13], %24 {strides = array<i32>} : memref<8x256xbf16, #tpu.memory_space<vmem>>, vector<8x256xbf16>,
    return
  }
  func.func @transform_0(%arg0: i32) -> (i32, i32) {
    %c0_i32 = arith.constant 0 : i32
    %c0_i32_0 = arith.constant 0 : i32
    return %arg0, %c0_i32 : i32, i32
  }
  func.func @transform_1(%arg0: i32) -> (i32, i32) {
    %c0_i32 = arith.constant 0 : i32
    %c0_i32_0 = arith.constant 0 : i32
    %c0_i32_1 = arith.constant 0 : i32
    return %c0_i32, %c0_i32_0 : i32, i32
  }
  func.func @transform_2(%arg0: i32) -> (i32, i32) {
    %c0_i32 = arith.constant 0 : i32
    %c0_i32_0 = arith.constant 0 : i32
    return %arg0, %c0_i32 : i32, i32
  }
  func.func @transform_3(%arg0: i32) -> (i32, i32) {
    %c0_i32 = arith.constant 0 : i32
    %c0_i32_0 = arith.constant 0 : i32
    return %arg0, %c0_i32 : i32, i32
  }
}

module attributes {stable_mosaic.version = 11 : i64} {
  func.func @kernel(%arg0: i32, %arg1: memref<8x128xbf16, #tpu.memory_space<vmem>>, %arg2: memref<128x256xbf16, #tpu.memory_space<vmem>>, %arg3: memref<8x256xbf16, #tpu.memory_space<vmem>>, %arg4: memref<8x256xbf16, #tpu.memory_space<vmem>>) attributes {dimension_semantics = [#tpu.dimension_semantics<parallel>], iteration_bounds = array<i64: 2>, scalar_prefetch = 0 : i64, scratch_operands = 0 : i64, tpu.core_type = #tpu.core_type<tc>, window_params = [{transform_indices = @transform_0, window_bounds = array<i64: 8, 128>}, {pipeline_mode = #tpu.pipeline_mode<synchronous>, transform_indices = @transform_1, window_bounds = array<i64: 128, 256>}, {transform_indices = @transform_2, window_bounds = array<i64: 8, 256>}, {transform_indices = @transform_3, window_bounds = array<i64: 8, 256>}]} {
    %c0 = arith.constant 0 : index
    %c0_0 = arith.constant 0 : index
    %0 = vector.load %arg1[%c0, %c0_0] : memref<8x128xbf16, #tpu.memory_space<vmem>>, vector<8x128xbf16>
    %c0_1 = arith.constant 0 : index
    %c0_2 = arith.constant 0 : index
    %1 = vector.load %arg2[%c0_1, %c0_2] : memref<128x256xbf16, #tpu.memory_space<vmem>>, vector<128x256xbf16>
    %cst = arith.constant dense<0.000000e+00> : vector<8x256xf32>
    %2 = tpu.matmul %0, %1, %cst {dimension_numbers = #tpu.dot_dimension_numbers<[1], [0], [0], [1], [0, 0, 1, 1], [], []>} : vector<8x128xbf16>, vector<128x256xbf16>, vector<8x256xf32> -> vector<8x256xf32>
    %3 = arith.truncf %2 : vector<8x256xf32> to vector<8x256xbf16>
    %c0_3 = arith.constant 0 : index
    %c0_4 = arith.constant 0 : index
    %4 = vector.load %arg4[%c0_3, %c0_4] : memref<8x256xbf16, #tpu.memory_space<vmem>>, vector<8x256xbf16>
    tpu.vector_store %arg4[%c0_3, %c0_4], %3 {strides = array<i32>} : memref<8x256xbf16, #tpu.memory_space<vmem>>, vector<8x256xbf16>,
    %5 = tpu.iota {dimensions = array<i32: 1>} : vector<8x256xi32>
    %c200_i32 = arith.constant 200 : i32
    %6 = vector.broadcast %c200_i32 : i32 to vector<8x256xi32>
    %7 = arith.cmpi slt, %5, %6 : vector<8x256xi32>
    %cst_5 = arith.constant 0xFF800000 : f32
    %8 = vector.broadcast %cst_5 : f32 to vector<8x256xf32>
    %9 = arith.select %7, %2, %8 : vector<8x256xi1>, vector<8x256xf32>
    %cst_6 = arith.constant dense<0xFF800000> : vector<8xf32>
    %10 = vector.multi_reduction <maximumf>, %9, %cst_6 [1] : vector<8x256xf32> to vector<8xf32>
    %11 = vector.shape_cast %10 : vector<8xf32> to vector<8x1xf32>
    %12 = vector.broadcast %11 : vector<8x1xf32> to vector<8x256xf32>
    %13 = arith.subf %9, %12 : vector<8x256xf32>
    %14 = math.exp %13 : vector<8x256xf32>
    %cst_7 = arith.constant dense<0.000000e+00> : vector<8xf32>
    %15 = vector.multi_reduction <add>, %14, %cst_7 [1] : vector<8x256xf32> to vector<8xf32>
    %16 = vector.shape_cast %15 : vector<8xf32> to vector<8x1xf32>
    %17 = arith.truncf %14 : vector<8x256xf32> to vector<8x256xbf16>
    %c0_8 = arith.constant 0 : index
    %c0_9 = arith.constant 0 : index
    %18 = vector.load %arg3[%c0_8, %c0_9] : memref<8x256xbf16, #tpu.memory_space<vmem>>, vector<8x256xbf16>
    tpu.vector_store %arg3[%c0_8, %c0_9], %17 {strides = array<i32>} : memref<8x256xbf16, #tpu.memory_space<vmem>>, vector<8x256xbf16>,
    %19 = tpu.reciprocal %16 {approx = true} : vector<8x1xf32> -> vector<8x1xf32>
    %c0_10 = arith.constant 0 : index
    %c0_11 = arith.constant 0 : index
    %20 = vector.load %arg3[%c0_10, %c0_11] : memref<8x256xbf16, #tpu.memory_space<vmem>>, vector<8x256xbf16>
    %21 = arith.extf %20 : vector<8x256xbf16> to vector<8x256xf32>
    %22 = vector.broadcast %19 : vector<8x1xf32> to vector<8x256xf32>
    %23 = arith.mulf %21, %22 : vector<8x256xf32>
    %24 = arith.truncf %23 : vector<8x256xf32> to vector<8x256xbf16>
    %c0_12 = arith.constant 0 : index
    %c0_13 = arith.constant 0 : index
    %25 = vector.load %arg3[%c0_12, %c0_13] : memref<8x256xbf16, #tpu.memory_space<vmem>>, vector<8x256xbf16>
    tpu.vector_store %arg3[%c0_12, %c0_13], %24 {strides = array<i32>} : memref<8x256xbf16, #tpu.memory_space<vmem>>, vector<8x256xbf16>,
    return
  }
  func.func @transform_0(%arg0: i32) -> (i32, i32) {
    %c0_i32 = arith.constant 0 : i32
    %c0_i32_0 = arith.constant 0 : i32
    return %arg0, %c0_i32 : i32, i32
  }
  func.func @transform_1(%arg0: i32) -> (i32, i32) {
    %c0_i32 = arith.constant 0 : i32
    %c0_i32_0 = arith.constant 0 : i32
    %c0_i32_1 = arith.constant 0 : i32
    return %c0_i32, %c0_i32_0 : i32, i32
  }
  func.func @transform_2(%arg0: i32) -> (i32, i32) {
    %c0_i32 = arith.constant 0 : i32
    %c0_i32_0 = arith.constant 0 : i32
    return %arg0, %c0_i32 : i32, i32
  }
  func.func @transform_3(%arg0: i32) -> (i32, i32) {
    %c0_i32 = arith.constant 0 : i32
    %c0_i32_0 = arith.constant 0 : i32
    return %arg0, %c0_i32 : i32, i32
  }
}

</mosaic_0001>

<bundles_post_ra>
// kernel: tpu_custom_call.1
= control target key start
LH: loop header
LB: loop body
LE: loop exit
PB: predicated region body
PF: predicated region fallthrough
CT: control target
= control target key end

     0   :  { %9 = vsyncpa [#allocation3], 0  ;;  %s1050_s0 = inlined_call_operand.hbm [shape: bf16[16,128], index: 0, kind: input, shape index: {}]   ;;  %s1051_s1 = inlined_call_operand.hbm [shape: bf16[128,256], index: 1, kind: input, shape index: {}]   ;;  %s1052_s2 = inlined_call_operand.hbm [shape: bf16[16,256], index: 2, kind: output, shape index: {0}]   ;;  %s1053_s3 = inlined_call_operand.hbm [shape: bf16[16,256], index: 3, kind: output, shape index: {1}]  }
   0x1   :  { %11 = vsyncpa [#allocation3 + $0x1], 0 }
   0x2   :  { %12 = vsyncpa [#allocation6], 0 }
   0x3   :  { %13 = vsyncpa [#allocation4], 0 }
   0x4   :  { %15 = vsyncpa [#allocation4 + $0x1], 0 }
   0x5   :  { %16 = vsyncpa [#allocation9], 0 }
   0x6   :  { %18 = vsyncpa [#allocation9 + $0x1], 0  ;;  %s868_s12 = smov 0   ;;  %s870_s13 = smov 0  }
   0x7   :  { %s872_s14 = smov 0   ;;  %s874_s15 = smov 0  }
   0x8 LB: > { %s889_s16 = sadd.s32 4294967295, %s839_s15   ;;  %s549_s17 = sadd.s32 4294967294, %s839_s15   ;;  %s839_s15 = sphi %s874_s15, %s1075_s15   ;;  %s835_s14 = sphi %s872_s14, %s1074_s14   ;;  %s831_s13 = sphi %s870_s13, %s1073_s13   ;;  %s827_s12 = sphi %s868_s12, %s1072_s12  }
   0x9   : > { %p44_p0 = scmp.ne.s32.totalorder %s831_s13, %s827_s12  ;;  %p1054_p1 = scmp.eq.s32.totalorder %s889_s16, 0 }
   0xa   : > { %p95_p3 = scmp.eq.s32.totalorder %s549_s17, 1  ;;  %p550_p5 = scmp.ge.s32.totalorder %s839_s15, 1 }
   0xb   : > { %p898_p4 = por %p1054_p1, %p44_p0  ;;  %p128_p7 = scmp.lt.s32.totalorder %s839_s15, 3 }
   0xc   : > { %p903_p6 = por %p95_p3, %p44_p0  ;;  %s841_s21 = smov [#allocation5]  }
   0xd   : > { %s1058_s18 = scalar_select %p898_p4, 1, 0 }
   0xe   : > { %s1059_s19 = scalar_select %p903_p6, 1, 0 }
   0xf   : > { %p908_p8 = pnand %p550_p5, %p128_p7  ;;  %s140_s22 = sshll.u32 %s841_s21, 4  ;;  %s141_s22 = int_to_ptr.vmem [resolvable:$true] %s140_s22 }
  0x10   : > { %s922_s24 = sadd.s32 1, %s839_s15   ;;  %s31_s25 = sadd.s32 1, %s835_s14 }
  0x11   : > { %s1060_s20 = scalar_select %p908_p8, 1, 0 }
  0x12   : > { %p602_p9 = pneg %p908_p8  ;;  %s28_s26 = ssub.s32 %s839_s15, %s922_s24 }
  0x13   : > { %s698_s27 = scalar_lea.vmem %s141_s22, 2048  ;;  %p706_p5 = scmp.lt.s32.totalorder %s141_s22, %s141_s22 }
  0x14   : > { %p917_p11 = pnand %p602_p9, %p1054_p1  ;;  %p699_p13 = scmp.ne.s32.totalorder %s141_s22, %s698_s27 }
  0x15   : > { %p707_p7 = scmp.lt.s32.totalorder %s698_s27, %s698_s27 }
  0x16   : > { %p689_p12 = pneg %p917_p11 }
  0x17   : > { %p708_p10 = por %p707_p7, %p706_p5 }
  0x18   : > { %p701_p0 = pnand %p699_p13, %p689_p12 }
  0x1a   : > { %p702_p3 = pneg %p701_p0 }
  0x1c   : > { %p709_p2 = pnand %p708_p10, %p702_p3 }
  0x1e   : > { %712 = shalt.err (!%p709_p2)
}
  0x1f   : > { %s842_s28 = smov 128   ;;  %s843_s29 = smov 8  }
  0x20   : > { %605 = dma.hbm_to_vmem [thread:$0]  (!%p917_p11), %s1051_s1, 2048, %s141_s22, [#allocation6], %s842_s28, %s842_s28, %s843_s29  }
  0x21   : > { %p29_p9 = scmp.eq.s32.totalorder %s28_s26, 0  ;;  %p38_p12 = scmp.ne.s32.totalorder %s835_s14, %s831_s13 }
  0x22   : > { %p39_p10 = scmp.eq.s32.totalorder %s839_s15, 0  ;;  %p618_p2 = scmp.lt.s32.totalorder %s839_s15, 2 }
  0x23   : > { %s939_s5 = scalar_select %p29_p9, %s835_s14, %s31_s25  }
  0x24   : > { %p40_p13 = por %p39_p10, %p38_p12  ;;  %p1062_p0 = scmp.eq.s32.totalorder %s889_s16, 1 }
  0x25   : > { %s154_s7 = sand.u32 1, %s835_s14   ;;  %s554_s8 = sshll.u32 %s839_s15, 6 }
  0x26   : > { %p943_p3 = por %p1062_p0, %p38_p12  ;;  %s553_s9 = sshll.u32 %s154_s7, 2 }
  0x27   : > { %s952_s17 = scalar_lea.hbm %s1050_s0, %s554_s8  ;;  %s158_s21 = scalar_lea.vmem [#allocation2], %s553_s9 }
  0x28   : > { %s1063_s6 = scalar_select %p943_p3, 1, 0 }
  0x29   : > { %s165_s22 = sshll.u32 %s158_s21, 4  ;;  %p954_p11 = pnand %p618_p2, %p40_p13  ;;  %s166_s22 = int_to_ptr.vmem [resolvable:$true] %s165_s22 }
  0x2a   : > { %s155_s25 = scalar_lea.sflag [#allocation3], %s154_s7  ;;  %s713_s26 = scalar_lea.hbm %s952_s17, 64 }
  0x2b   : > { %p714_p5 = scmp.ne.s32.totalorder %s952_s17, %s713_s26  ;;  %p715_p7 = pneg %p954_p11 }
  0x2c   : > { %s718_s29 = scalar_lea.hbm %s1050_s0, 128  ;;  %p719_p10 = scmp.lt.s32.totalorder %s952_s17, %s1050_s0 }
  0x2d   : > { %p716_p9 = pnand %p715_p7, %p714_p5  ;;  %p720_p2 = scmp.lt.s32.totalorder %s718_s29, %s713_s26 }
  0x2f   : > { %p717_p12 = pneg %p716_p9  ;;  %p721_p13 = por %p720_p2, %p719_p10 }
  0x31   : > { %p722_p0 = pnand %p721_p13, %p717_p12 }
  0x33   : > { %725 = shalt.err (!%p722_p0)
}
  0x34   : > { %s726_s8 = scalar_lea.vmem %s166_s22, 64  ;;  %s844_s7 = smov [#allocation2]  }
  0x35   : > { %p727_p1 = scmp.ne.s32.totalorder %s166_s22, %s726_s8  ;;  %s731_s9 = sshll.u32 %s844_s7, 4  ;;  %s732_s9 = int_to_ptr.vmem [resolvable:$false] %s731_s9 }
  0x36   : > { %s733_s10 = scalar_lea.vmem %s732_s9, 128  ;;  %p734_p5 = scmp.lt.s32.totalorder %s166_s22, %s732_s9 }
  0x37   : > { %p729_p6 = pnand %p727_p1, %p715_p7  ;;  %p735_p9 = scmp.lt.s32.totalorder %s733_s10, %s726_s8 }
  0x39   : > { %p730_p3 = pneg %p729_p6  ;;  %p736_p4 = por %p735_p9, %p734_p5 }
  0x3b   : > { %p737_p8 = pnand %p736_p4, %p730_p3 }
  0x3d   : > { %740 = shalt.err (!%p737_p8)
}
  0x3e   : > { %609 = dma.hbm_to_vmem [thread:$0]  (!%p954_p11), %s952_s17, 64, %s166_s22, %s155_s25  }
  0x3f   : > { %p1065_p12 = scmp.ne.s32.totalorder %s1060_s20, 0 }
  0x40   : > { %s975_s11 = sand.u32 (!%p1065_p12), 1, %s831_s13   ;;  %p1066_p1 = scmp.ne.s32.totalorder (!%p1065_p12), %s1058_s18, 0 }
  0x41   : > { %174 = sbr.rel (%p1065_p12) target bundleno = 633 (0x279), region = 28  ;;  %s556_s21 = sshll.u32 (!%p1065_p12), %s975_s11, 2 }
  0x42   : > { %s177_s26 = scalar_lea.sflag (!%p1065_p12), [#allocation3], %s975_s11  ;;  %s979_s27 = scalar_lea.vmem (!%p1065_p12), [#allocation2], %s556_s21 }
  0x46   : > { %810 = dma.done.wait (%p1066_p1), %s177_s26, 64  }
  0x47   : > { %812 = vsyncadd (%p1066_p1), %s177_s26, 4294967232  ;;  %p1067_p4 = scmp.eq.s32.totalorder %s889_s16, 0 }
  0x49   : > { %814 = dma.done.wait (%p1067_p4), [#allocation6], 2048   ;;  %p1068_p6 = pmov %p1067_p4 }
  0x4a   : > { %v845_v0 = vmov 0   ;;  %v657_v1 = vld [vmem:[#allocation5 + $0x74] ss:$8 sps:$4 sm:$0xff]   ;;  %v659_v2 = vld [vmem:[#allocation5 + $0x70] ss:$8 sps:$4 sm:$0xff]   ;;  %v360_v18 = vlaneseq  ;;  %s558_s18 = sshll.u32 %s975_s11, 3 }
  0x4b   : > { %816 = vsyncadd (%p1068_p6), [#allocation6], 4294965248  ;;  %342 = vmatprep.mubr.bf16.mxu0 %v845_v0  ;;  %310 = vmatprep.subr.bf16.mxu0 %v657_v1  ;;  %v660_v3 = vld [vmem:[#allocation5 + $0x64] ss:$8 sps:$4 sm:$0xff]   ;;  %v662_v4 = vld [vmem:[#allocation5 + $0x60] ss:$8 sps:$4 sm:$0xff]  }
  0x4c   : > { %311 = vmatpush1.bf16.msra.mxu0 %v659_v2  ;;  %v663_v5 = vld [vmem:[#allocation5 + $0x54] ss:$8 sps:$4 sm:$0xff]   ;;  %v665_v6 = vld [vmem:[#allocation5 + $0x50] ss:$8 sps:$4 sm:$0xff]   ;;  %v666_v7 = vld [vmem:[#allocation5 + $0x44] ss:$8 sps:$4 sm:$0xff]  }
  0x4d   : > { %312 = vmatprep.subr.bf16.mxu0 %v660_v3  ;;  %v668_v8 = vld [vmem:[#allocation5 + $0x40] ss:$8 sps:$4 sm:$0xff]   ;;  %v669_v9 = vld [vmem:[#allocation5 + $0x34] ss:$8 sps:$4 sm:$0xff]   ;;  %v671_v10 = vld [vmem:[#allocation5 + $0x30] ss:$8 sps:$4 sm:$0xff]  }
  0x4e   : > { %v672_v11 = vld [vmem:[#allocation5 + $0x24] ss:$8 sps:$4 sm:$0xff]   ;;  %v674_v12 = vld [vmem:[#allocation5 + $0x20] ss:$8 sps:$4 sm:$0xff]   ;;  %v675_v13 = vld [vmem:[#allocation5 + $0x14] ss:$8 sps:$4 sm:$0xff]  }
  0x4f   : > { %v677_v14 = vld [vmem:[#allocation5 + $0x10] ss:$8 sps:$4 sm:$0xff]   ;;  %v678_v15 = vld [vmem:[#allocation5 + $0x4] ss:$8 sps:$4 sm:$0xff]   ;;  %v680_v16 = vld [vmem:[#allocation5] ss:$8 sps:$4 sm:$0xff]  }
  0x50   : > { %313 = vmatpush1.bf16.msra.mxu0 %v662_v4  ;;  %v213_v17 = vld [vmem:[%s979_s27] sm:$0xf]  ;;  %v361_v19 = vand.u32 127, %v360_v18  ;;  %s211_s20 = scalar_lea.vmem [#allocation8], %s558_s18  ;;  %s590_s17 = sshll.u32 %s889_s16, 7 }
  0x51   : > { %314 = vmatprep.subr.bf16.mxu0 %v663_v5  ;;  %s435_s25 = scalar_lea.hbm %s1053_s3, %s590_s17  ;;  %s437_s28 = sshll.u32 %s211_s20, 4  ;;  %s438_s28 = int_to_ptr.vmem [resolvable:$true] %s437_s28 }
  0x52   : > { %v362_v20 = vadd.s32 128, %v361_v19  ;;  %s409_s29 = scalar_lea.sflag [#allocation9], %s975_s11  ;;  %s741_s30 = scalar_lea.vmem %s438_s28, 128 }
  0x53   : > { %p742_p8 = scmp.ne.s32.totalorder %s438_s28, %s741_s30  ;;  %p1069_p3 = scmp.ne.s32.totalorder %s1063_s6, 0 }
  0x54   : > { %315 = vmatpush1.bf16.msra.mxu0 %v665_v6  ;;  %vm364_vm0 = vcmp.lt.s32.totalorder %v362_v20, 200  ;;  %s846_s4 = smov [#allocation8]  }
  0x55   : > { %316 = vmatprep.subr.bf16.mxu0 %v666_v7  ;;  %p743_p11 = pnand %p742_p8, %p1069_p3  ;;  %s745_s8 = sshll.u32 %s846_s4, 4  ;;  %s746_s8 = int_to_ptr.vmem [resolvable:$false] %s745_s8 }
  0x56   : > { %s747_s7 = scalar_lea.vmem %s746_s8, 256  ;;  %p748_p10 = scmp.lt.s32.totalorder %s438_s28, %s746_s8 }
  0x57   : > { %p744_p7 = pneg %p743_p11  ;;  %p749_p2 = scmp.lt.s32.totalorder %s747_s7, %s741_s30 }
  0x58   : > { %317 = vmatpush1.bf16.msra.mxu0 %v668_v8 }
  0x59   : > { %318 = vmatprep.subr.bf16.mxu0 %v669_v9  ;;  %p750_p13 = por %p749_p2, %p748_p10 }
  0x5b   : > { %p751_p0 = pnand %p750_p13, %p744_p7 }
  0x5c   : > { %319 = vmatpush1.bf16.msra.mxu0 %v671_v10 }
  0x5d   : > { %320 = vmatprep.subr.bf16.mxu0 %v672_v11 }
  0x60   : > { %321 = vmatpush1.bf16.msra.mxu0 %v674_v12 }
  0x61   : > { %322 = vmatprep.subr.bf16.mxu0 %v675_v13 }
  0x64   : > { %323 = vmatpush1.bf16.msra.mxu0 %v677_v14 }
  0x65   : > { %324 = vmatprep.subr.bf16.mxu0 %v678_v15 }
  0x68   : > { %325 = vmatpush1.bf16.msra.mxu0 %v680_v16 }
  0x6b   : > { %343 = vmatmul.mubr.bf16.vlgmr.msra.gmra.mxu0 %v213_v17 }
 0x12b   : > { %v344_v21 = vpop.f32.mrf.mxu0 }
 0x12d   : > { %v346_v22 = vpop.f32.mrf.mxu0 }
 0x12e   : > { %v587_v23 = vpack.c.bf16 %v346_v22, %v344_v21  ;;  %v366_v24 = vsel %vm364_vm0, %v346_v22, -inf }
 0x12f   : > { %v348_v25 = vpop.f32.mrf.mxu0  ;;  %v367_v26 = vmax.f32 %v344_v21, %v366_v24 }
 0x130   : > { %359 = vst [vmem:[%s211_s20] sm:$0xff] %v587_v23 }
 0x131   : > { %368 = vmax.xlane.f32.xlu0 %v367_v26  ;;  %v349_v27 = vpop.f32.mrf.mxu0 }
 0x1ba   : > { %v369_v28 = vpop.xlane.xlu0 %368 }
 0x1bb   : > { %v370_v29 = vsub.f32 %v344_v21, %v369_v28  ;;  %v371_v30 = vsub.f32 %v366_v24, %v369_v28 }
 0x1bd   : > { %v372_v31 = vmul.f32 1.442695, %v370_v29  ;;  %v374_v32 = vmul.f32 1.442695, %v371_v30 }
 0x1bf   : > { %681 = vpow2.f32 %v372_v31 }
 0x1c0   : > { %683 = vpow2.f32 %v374_v32 }
 0x1cc   : > { %v682_v33 = vpop.eup %681 }
 0x1cd   : > { %v684_v34 = vpop.eup %683 }
 0x1ce   : > { %v376_v35 = vadd.f32 %v684_v34, %v682_v33  ;;  %v588_v36 = vpack.c.bf16 %v684_v34, %v682_v33 }
 0x1d0   : > { %377 = vadd.xlane.f32.xlu0 %v376_v35 }
 0x1d1   : > { %754 = shalt.err (!%p751_p0)
}
 0x1d2   : > { %s755_s9 = scalar_lea.hbm %s435_s25, 128  ;;  %s759_s26 = scalar_lea.hbm %s1053_s3, 256 }
 0x1d3   : > { %p756_p5 = scmp.ne.s32.totalorder %s435_s25, %s755_s9  ;;  %p760_p1 = scmp.lt.s32.totalorder %s435_s25, %s1053_s3 }
 0x1d4   : > { %p761_p4 = scmp.lt.s32.totalorder %s759_s26, %s755_s9 }
 0x1d5   : > { %p757_p9 = pnand %p756_p5, %p1069_p3 }
 0x1d6   : > { %p762_p6 = por %p761_p4, %p760_p1 }
 0x1d7   : > { %p758_p12 = pneg %p757_p9 }
 0x1d9   : > { %p763_p8 = pnand %p762_p6, %p758_p12 }
 0x1db   : > { %766 = shalt.err (!%p763_p8)
}
 0x1dc   : > { %599 = dma.vmem_to_hbm [thread:$0]  (%p1069_p3), %s438_s28, 128, %s435_s25, %s409_s29   ;;  %v390_v38 = vunpack.c.l.bf16 %v588_v36  ;;  %v391_v39 = vunpack.c.h.bf16 %v588_v36 }
 0x1dd   : > { %s204_s22 = scalar_lea.vmem [#allocation7], %s558_s18  ;;  %s421_s8 = scalar_lea.hbm %s1052_s2, %s590_s17 }
 0x1de   : > { %s423_s23 = sshll.u32 %s204_s22, 4  ;;  %s404_s25 = scalar_lea.sflag [#allocation4], %s975_s11  ;;  %s424_s23 = int_to_ptr.vmem [resolvable:$true] %s423_s23 }
 0x1df   : > { %s767_s28 = scalar_lea.vmem %s424_s23, 128  ;;  %s847_s29 = smov [#allocation7]  }
 0x1e0   : > { %p768_p11 = scmp.ne.s32.totalorder %s424_s23, %s767_s28  ;;  %s771_s7 = sshll.u32 %s847_s29, 4  ;;  %s772_s7 = int_to_ptr.vmem [resolvable:$false] %s771_s7 }
 0x1e1   : > { %s773_s18 = scalar_lea.vmem %s772_s7, 256  ;;  %p774_p2 = scmp.lt.s32.totalorder %s424_s23, %s772_s7 }
 0x1e2   : > { %p769_p7 = pnand %p768_p11, %p1069_p3  ;;  %p775_p13 = scmp.lt.s32.totalorder %s773_s18, %s767_s28 }
 0x1e4   : > { %p770_p10 = pneg %p769_p7  ;;  %p776_p0 = por %p775_p13, %p774_p2 }
 0x1e6   : > { %p777_p5 = pnand %p776_p0, %p770_p10 }
 0x259   : > { %v378_v37 = vpop.xlane.xlu0 %377 }
 0x25a   : > { %685 = vrcp.f32 %v378_v37 }
 0x267   : > { %v686_v40 = vpop.eup %685 }
 0x268   : > { %v392_v41 = vmul.f32 %v686_v40, %v390_v38  ;;  %v393_v42 = vmul.f32 %v686_v40, %v391_v39 }
 0x26a   : > { %v589_v43 = vpack.c.bf16 %v393_v42, %v392_v41 }
 0x26c   : > { %402 = vst [vmem:[%s204_s22] sm:$0xff] %v589_v43 }
 0x26d   : > { %780 = shalt.err (!%p777_p5)
}
 0x26e   : > { %s781_s16 = scalar_lea.hbm %s421_s8, 128  ;;  %s785_s9 = scalar_lea.hbm %s1052_s2, 256 }
 0x26f   : > { %p782_p9 = scmp.ne.s32.totalorder %s421_s8, %s781_s16  ;;  %p786_p4 = scmp.lt.s32.totalorder %s421_s8, %s1052_s2 }
 0x270   : > { %p787_p6 = scmp.lt.s32.totalorder %s785_s9, %s781_s16 }
 0x271   : > { %p783_p12 = pnand %p782_p9, %p1069_p3 }
 0x272   : > { %p788_p8 = por %p787_p6, %p786_p4 }
 0x273   : > { %p784_p1 = pneg %p783_p12 }
 0x275   : > { %p789_p11 = pnand %p788_p8, %p784_p1 }
 0x277   : > { %792 = shalt.err (!%p789_p11)
}
 0x278   : > { %598 = dma.vmem_to_hbm [thread:$0]  (%p1069_p3), %s424_s23, 128, %s421_s8, %s404_s25  }
 0x279 PF: > { %s449_s26 = sand.u32 1, %s827_s12   ;;  %p1070_p7 = scmp.ne.s32.totalorder %s1059_s19, 0 }
 0x27a   : > { %p1071_p10 = scmp.ge.s32.totalorder %s839_s15, 2  ;;  %s450_s27 = scalar_lea.sflag [#allocation4], %s449_s26 }
 0x27c   : > { %p611_p2 = pnand %p1071_p10, %p1070_p7 }
 0x27e   : > { %p612_p13 = pneg %p611_p2 }
 0x280   : > { %818 = dma.done.wait (%p612_p13), %s450_s27, 128  }
 0x281   : > { %820 = vsyncadd (%p612_p13), %s450_s27, 4294967168  ;;  %s459_s20 = scalar_lea.sflag [#allocation9], %s449_s26 }
 0x282   : > { %822 = dma.done.wait (%p612_p13), %s459_s20, 128  }
 0x283   : > { %824 = vsyncadd (%p612_p13), %s459_s20, 4294967168  ;;  %p21_p3 = scmp.ge.s32.totalorder %s922_s24, 4   ;;  %s1072_s12 = smov %s831_s13 }
 0x284   : > { %s1073_s13 = smov %s835_s14  ;;  %s1074_s14 = smov %s939_s5 }
 0x285   : > { %s1075_s15 = smov %s922_s24  ;;  %23 = sbr.rel (!%p21_p3) target bundleno = 8 (0x8), region = 94 }
 0x28a   :  { %464 = vsyncpa [#allocation3], 1 }
 0x28b   :  { %466 = vsyncpa [#allocation3 + $0x1], 1 }
 0x28c   :  { %467 = vsyncpa [#allocation6], 1 }
 0x28d   :  { %468 = vsyncpa [#allocation4], 1 }
 0x28e   :  { %470 = vsyncpa [#allocation4 + $0x1], 1 }
 0x28f   :  { %471 = vsyncpa [#allocation9], 1 }
 0x290   :  { %473 = vsyncpa [#allocation9 + $0x1], 1 }

// kernel: tpu_custom_call.1
= control target key start
LH: loop header
LB: loop body
LE: loop exit
PB: predicated region body
PF: predicated region fallthrough
CT: control target
= control target key end

     0   :  { %9 = vsyncpa [#allocation3], 0  ;;  %s1050_s0 = inlined_call_operand.hbm [shape: bf16[16,128], index: 0, kind: input, shape index: {}]   ;;  %s1051_s1 = inlined_call_operand.hbm [shape: bf16[128,256], index: 1, kind: input, shape index: {}]   ;;  %s1052_s2 = inlined_call_operand.hbm [shape: bf16[16,256], index: 2, kind: output, shape index: {0}]   ;;  %s1053_s3 = inlined_call_operand.hbm [shape: bf16[16,256], index: 3, kind: output, shape index: {1}]  }
   0x1   :  { %11 = vsyncpa [#allocation3 + $0x1], 0 }
   0x2   :  { %12 = vsyncpa [#allocation6], 0 }
   0x3   :  { %13 = vsyncpa [#allocation4], 0 }
   0x4   :  { %15 = vsyncpa [#allocation4 + $0x1], 0 }
   0x5   :  { %16 = vsyncpa [#allocation9], 0 }
   0x6   :  { %18 = vsyncpa [#allocation9 + $0x1], 0  ;;  %s868_s12 = smov 0   ;;  %s870_s13 = smov 0  }
   0x7   :  { %s872_s14 = smov 0   ;;  %s874_s15 = smov 0  }
   0x8 LB: > { %s889_s16 = sadd.s32 4294967295, %s839_s15   ;;  %s549_s17 = sadd.s32 4294967294, %s839_s15   ;;  %s839_s15 = sphi %s874_s15, %s1075_s15   ;;  %s835_s14 = sphi %s872_s14, %s1074_s14   ;;  %s831_s13 = sphi %s870_s13, %s1073_s13   ;;  %s827_s12 = sphi %s868_s12, %s1072_s12  }
   0x9   : > { %p44_p0 = scmp.ne.s32.totalorder %s831_s13, %s827_s12  ;;  %p1054_p1 = scmp.eq.s32.totalorder %s889_s16, 0 }
   0xa   : > { %p95_p3 = scmp.eq.s32.totalorder %s549_s17, 1  ;;  %p550_p5 = scmp.ge.s32.totalorder %s839_s15, 1 }
   0xb   : > { %p898_p4 = por %p1054_p1, %p44_p0  ;;  %p128_p7 = scmp.lt.s32.totalorder %s839_s15, 3 }
   0xc   : > { %p903_p6 = por %p95_p3, %p44_p0  ;;  %s841_s21 = smov [#allocation5]  }
   0xd   : > { %s1058_s18 = scalar_select %p898_p4, 1, 0 }
   0xe   : > { %s1059_s19 = scalar_select %p903_p6, 1, 0 }
   0xf   : > { %p908_p8 = pnand %p550_p5, %p128_p7  ;;  %s140_s22 = sshll.u32 %s841_s21, 4  ;;  %s141_s22 = int_to_ptr.vmem [resolvable:$true] %s140_s22 }
  0x10   : > { %s922_s24 = sadd.s32 1, %s839_s15   ;;  %s31_s25 = sadd.s32 1, %s835_s14 }
  0x11   : > { %s1060_s20 = scalar_select %p908_p8, 1, 0 }
  0x12   : > { %p602_p9 = pneg %p908_p8  ;;  %s28_s26 = ssub.s32 %s839_s15, %s922_s24 }
  0x13   : > { %s698_s27 = scalar_lea.vmem %s141_s22, 2048  ;;  %p706_p5 = scmp.lt.s32.totalorder %s141_s22, %s141_s22 }
  0x14   : > { %p917_p11 = pnand %p602_p9, %p1054_p1  ;;  %p699_p13 = scmp.ne.s32.totalorder %s141_s22, %s698_s27 }
  0x15   : > { %p707_p7 = scmp.lt.s32.totalorder %s698_s27, %s698_s27 }
  0x16   : > { %p689_p12 = pneg %p917_p11 }
  0x17   : > { %p708_p10 = por %p707_p7, %p706_p5 }
  0x18   : > { %p701_p0 = pnand %p699_p13, %p689_p12 }
  0x1a   : > { %p702_p3 = pneg %p701_p0 }
  0x1c   : > { %p709_p2 = pnand %p708_p10, %p702_p3 }
  0x1e   : > { %712 = shalt.err (!%p709_p2)
}
  0x1f   : > { %s842_s28 = smov 128   ;;  %s843_s29 = smov 8  }
  0x20   : > { %605 = dma.hbm_to_vmem [thread:$0]  (!%p917_p11), %s1051_s1, 2048, %s141_s22, [#allocation6], %s842_s28, %s842_s28, %s843_s29  }
  0x21   : > { %p29_p9 = scmp.eq.s32.totalorder %s28_s26, 0  ;;  %p38_p12 = scmp.ne.s32.totalorder %s835_s14, %s831_s13 }
  0x22   : > { %p39_p10 = scmp.eq.s32.totalorder %s839_s15, 0  ;;  %p618_p2 = scmp.lt.s32.totalorder %s839_s15, 2 }
  0x23   : > { %s939_s5 = scalar_select %p29_p9, %s835_s14, %s31_s25  }
  0x24   : > { %p40_p13 = por %p39_p10, %p38_p12  ;;  %p1062_p0 = scmp.eq.s32.totalorder %s889_s16, 1 }
  0x25   : > { %s154_s7 = sand.u32 1, %s835_s14   ;;  %s554_s8 = sshll.u32 %s839_s15, 6 }
  0x26   : > { %p943_p3 = por %p1062_p0, %p38_p12  ;;  %s553_s9 = sshll.u32 %s154_s7, 2 }
  0x27   : > { %s952_s17 = scalar_lea.hbm %s1050_s0, %s554_s8  ;;  %s158_s21 = scalar_lea.vmem [#allocation2], %s553_s9 }
  0x28   : > { %s1063_s6 = scalar_select %p943_p3, 1, 0 }
  0x29   : > { %s165_s22 = sshll.u32 %s158_s21, 4  ;;  %p954_p11 = pnand %p618_p2, %p40_p13  ;;  %s166_s22 = int_to_ptr.vmem [resolvable:$true] %s165_s22 }
  0x2a   : > { %s155_s25 = scalar_lea.sflag [#allocation3], %s154_s7  ;;  %s713_s26 = scalar_lea.hbm %s952_s17, 64 }
  0x2b   : > { %p714_p5 = scmp.ne.s32.totalorder %s952_s17, %s713_s26  ;;  %p715_p7 = pneg %p954_p11 }
  0x2c   : > { %s718_s29 = scalar_lea.hbm %s1050_s0, 128  ;;  %p719_p10 = scmp.lt.s32.totalorder %s952_s17, %s1050_s0 }
  0x2d   : > { %p716_p9 = pnand %p715_p7, %p714_p5  ;;  %p720_p2 = scmp.lt.s32.totalorder %s718_s29, %s713_s26 }
  0x2f   : > { %p717_p12 = pneg %p716_p9  ;;  %p721_p13 = por %p720_p2, %p719_p10 }
  0x31   : > { %p722_p0 = pnand %p721_p13, %p717_p12 }
  0x33   : > { %725 = shalt.err (!%p722_p0)
}
  0x34   : > { %s726_s8 = scalar_lea.vmem %s166_s22, 64  ;;  %s844_s7 = smov [#allocation2]  }
  0x35   : > { %p727_p1 = scmp.ne.s32.totalorder %s166_s22, %s726_s8  ;;  %s731_s9 = sshll.u32 %s844_s7, 4  ;;  %s732_s9 = int_to_ptr.vmem [resolvable:$false] %s731_s9 }
  0x36   : > { %s733_s10 = scalar_lea.vmem %s732_s9, 128  ;;  %p734_p5 = scmp.lt.s32.totalorder %s166_s22, %s732_s9 }
  0x37   : > { %p729_p6 = pnand %p727_p1, %p715_p7  ;;  %p735_p9 = scmp.lt.s32.totalorder %s733_s10, %s726_s8 }
  0x39   : > { %p730_p3 = pneg %p729_p6  ;;  %p736_p4 = por %p735_p9, %p734_p5 }
  0x3b   : > { %p737_p8 = pnand %p736_p4, %p730_p3 }
  0x3d   : > { %740 = shalt.err (!%p737_p8)
}
  0x3e   : > { %609 = dma.hbm_to_vmem [thread:$0]  (!%p954_p11), %s952_s17, 64, %s166_s22, %s155_s25  }
  0x3f   : > { %p1065_p12 = scmp.ne.s32.totalorder %s1060_s20, 0 }
  0x40   : > { %s975_s11 = sand.u32 (!%p1065_p12), 1, %s831_s13   ;;  %p1066_p1 = scmp.ne.s32.totalorder (!%p1065_p12), %s1058_s18, 0 }
  0x41   : > { %174 = sbr.rel (%p1065_p12) target bundleno = 633 (0x279), region = 28  ;;  %s556_s21 = sshll.u32 (!%p1065_p12), %s975_s11, 2 }
  0x42   : > { %s177_s26 = scalar_lea.sflag (!%p1065_p12), [#allocation3], %s975_s11  ;;  %s979_s27 = scalar_lea.vmem (!%p1065_p12), [#allocation2], %s556_s21 }
  0x46   : > { %810 = dma.done.wait (%p1066_p1), %s177_s26, 64  }
  0x47   : > { %812 = vsyncadd (%p1066_p1), %s177_s26, 4294967232  ;;  %p1067_p4 = scmp.eq.s32.totalorder %s889_s16, 0 }
  0x49   : > { %814 = dma.done.wait (%p1067_p4), [#allocation6], 2048   ;;  %p1068_p6 = pmov %p1067_p4 }
  0x4a   : > { %v845_v0 = vmov 0   ;;  %v657_v1 = vld [vmem:[#allocation5 + $0x74] ss:$8 sps:$4 sm:$0xff]   ;;  %v659_v2 = vld [vmem:[#allocation5 + $0x70] ss:$8 sps:$4 sm:$0xff]   ;;  %v360_v18 = vlaneseq  ;;  %s558_s18 = sshll.u32 %s975_s11, 3 }
  0x4b   : > { %816 = vsyncadd (%p1068_p6), [#allocation6], 4294965248  ;;  %342 = vmatprep.mubr.bf16.mxu0 %v845_v0  ;;  %310 = vmatprep.subr.bf16.mxu0 %v657_v1  ;;  %v660_v3 = vld [vmem:[#allocation5 + $0x64] ss:$8 sps:$4 sm:$0xff]   ;;  %v662_v4 = vld [vmem:[#allocation5 + $0x60] ss:$8 sps:$4 sm:$0xff]  }
  0x4c   : > { %311 = vmatpush1.bf16.msra.mxu0 %v659_v2  ;;  %v663_v5 = vld [vmem:[#allocation5 + $0x54] ss:$8 sps:$4 sm:$0xff]   ;;  %v665_v6 = vld [vmem:[#allocation5 + $0x50] ss:$8 sps:$4 sm:$0xff]   ;;  %v666_v7 = vld [vmem:[#allocation5 + $0x44] ss:$8 sps:$4 sm:$0xff]  }
  0x4d   : > { %312 = vmatprep.subr.bf16.mxu0 %v660_v3  ;;  %v668_v8 = vld [vmem:[#allocation5 + $0x40] ss:$8 sps:$4 sm:$0xff]   ;;  %v669_v9 = vld [vmem:[#allocation5 + $0x34] ss:$8 sps:$4 sm:$0xff]   ;;  %v671_v10 = vld [vmem:[#allocation5 + $0x30] ss:$8 sps:$4 sm:$0xff]  }
  0x4e   : > { %v672_v11 = vld [vmem:[#allocation5 + $0x24] ss:$8 sps:$4 sm:$0xff]   ;;  %v674_v12 = vld [vmem:[#allocation5 + $0x20] ss:$8 sps:$4 sm:$0xff]   ;;  %v675_v13 = vld [vmem:[#allocation5 + $0x14] ss:$8 sps:$4 sm:$0xff]  }
  0x4f   : > { %v677_v14 = vld [vmem:[#allocation5 + $0x10] ss:$8 sps:$4 sm:$0xff]   ;;  %v678_v15 = vld [vmem:[#allocation5 + $0x4] ss:$8 sps:$4 sm:$0xff]   ;;  %v680_v16 = vld [vmem:[#allocation5] ss:$8 sps:$4 sm:$0xff]  }
  0x50   : > { %313 = vmatpush1.bf16.msra.mxu0 %v662_v4  ;;  %v213_v17 = vld [vmem:[%s979_s27] sm:$0xf]  ;;  %v361_v19 = vand.u32 127, %v360_v18  ;;  %s211_s20 = scalar_lea.vmem [#allocation8], %s558_s18  ;;  %s590_s17 = sshll.u32 %s889_s16, 7 }
  0x51   : > { %314 = vmatprep.subr.bf16.mxu0 %v663_v5  ;;  %s435_s25 = scalar_lea.hbm %s1053_s3, %s590_s17  ;;  %s437_s28 = sshll.u32 %s211_s20, 4  ;;  %s438_s28 = int_to_ptr.vmem [resolvable:$true] %s437_s28 }
  0x52   : > { %v362_v20 = vadd.s32 128, %v361_v19  ;;  %s409_s29 = scalar_lea.sflag [#allocation9], %s975_s11  ;;  %s741_s30 = scalar_lea.vmem %s438_s28, 128 }
  0x53   : > { %p742_p8 = scmp.ne.s32.totalorder %s438_s28, %s741_s30  ;;  %p1069_p3 = scmp.ne.s32.totalorder %s1063_s6, 0 }
  0x54   : > { %315 = vmatpush1.bf16.msra.mxu0 %v665_v6  ;;  %vm364_vm0 = vcmp.lt.s32.totalorder %v362_v20, 200  ;;  %s846_s4 = smov [#allocation8]  }
  0x55   : > { %316 = vmatprep.subr.bf16.mxu0 %v666_v7  ;;  %p743_p11 = pnand %p742_p8, %p1069_p3  ;;  %s745_s8 = sshll.u32 %s846_s4, 4  ;;  %s746_s8 = int_to_ptr.vmem [resolvable:$false] %s745_s8 }
  0x56   : > { %s747_s7 = scalar_lea.vmem %s746_s8, 256  ;;  %p748_p10 = scmp.lt.s32.totalorder %s438_s28, %s746_s8 }
  0x57   : > { %p744_p7 = pneg %p743_p11  ;;  %p749_p2 = scmp.lt.s32.totalorder %s747_s7, %s741_s30 }
  0x58   : > { %317 = vmatpush1.bf16.msra.mxu0 %v668_v8 }
  0x59   : > { %318 = vmatprep.subr.bf16.mxu0 %v669_v9  ;;  %p750_p13 = por %p749_p2, %p748_p10 }
  0x5b   : > { %p751_p0 = pnand %p750_p13, %p744_p7 }
  0x5c   : > { %319 = vmatpush1.bf16.msra.mxu0 %v671_v10 }
  0x5d   : > { %320 = vmatprep.subr.bf16.mxu0 %v672_v11 }
  0x60   : > { %321 = vmatpush1.bf16.msra.mxu0 %v674_v12 }
  0x61   : > { %322 = vmatprep.subr.bf16.mxu0 %v675_v13 }
  0x64   : > { %323 = vmatpush1.bf16.msra.mxu0 %v677_v14 }
  0x65   : > { %324 = vmatprep.subr.bf16.mxu0 %v678_v15 }
  0x68   : > { %325 = vmatpush1.bf16.msra.mxu0 %v680_v16 }
  0x6b   : > { %343 = vmatmul.mubr.bf16.vlgmr.msra.gmra.mxu0 %v213_v17 }
 0x12b   : > { %v344_v21 = vpop.f32.mrf.mxu0 }
 0x12d   : > { %v346_v22 = vpop.f32.mrf.mxu0 }
 0x12e   : > { %v587_v23 = vpack.c.bf16 %v346_v22, %v344_v21  ;;  %v366_v24 = vsel %vm364_vm0, %v346_v22, -inf }
 0x12f   : > { %v348_v25 = vpop.f32.mrf.mxu0  ;;  %v367_v26 = vmax.f32 %v344_v21, %v366_v24 }
 0x130   : > { %359 = vst [vmem:[%s211_s20] sm:$0xff] %v587_v23 }
 0x131   : > { %368 = vmax.xlane.f32.xlu0 %v367_v26  ;;  %v349_v27 = vpop.f32.mrf.mxu0 }
 0x1ba   : > { %v369_v28 = vpop.xlane.xlu0 %368 }
 0x1bb   : > { %v370_v29 = vsub.f32 %v344_v21, %v369_v28  ;;  %v371_v30 = vsub.f32 %v366_v24, %v369_v28 }
 0x1bd   : > { %v372_v31 = vmul.f32 1.442695, %v370_v29  ;;  %v374_v32 = vmul.f32 1.442695, %v371_v30 }
 0x1bf   : > { %681 = vpow2.f32 %v372_v31 }
 0x1c0   : > { %683 = vpow2.f32 %v374_v32 }
 0x1cc   : > { %v682_v33 = vpop.eup %681 }
 0x1cd   : > { %v684_v34 = vpop.eup %683 }
 0x1ce   : > { %v376_v35 = vadd.f32 %v684_v34, %v682_v33  ;;  %v588_v36 = vpack.c.bf16 %v684_v34, %v682_v33 }
 0x1d0   : > { %377 = vadd.xlane.f32.xlu0 %v376_v35 }
 0x1d1   : > { %754 = shalt.err (!%p751_p0)
}
 0x1d2   : > { %s755_s9 = scalar_lea.hbm %s435_s25, 128  ;;  %s759_s26 = scalar_lea.hbm %s1053_s3, 256 }
 0x1d3   : > { %p756_p5 = scmp.ne.s32.totalorder %s435_s25, %s755_s9  ;;  %p760_p1 = scmp.lt.s32.totalorder %s435_s25, %s1053_s3 }
 0x1d4   : > { %p761_p4 = scmp.lt.s32.totalorder %s759_s26, %s755_s9 }
 0x1d5   : > { %p757_p9 = pnand %p756_p5, %p1069_p3 }
 0x1d6   : > { %p762_p6 = por %p761_p4, %p760_p1 }
 0x1d7   : > { %p758_p12 = pneg %p757_p9 }
 0x1d9   : > { %p763_p8 = pnand %p762_p6, %p758_p12 }
 0x1db   : > { %766 = shalt.err (!%p763_p8)
}
 0x1dc   : > { %599 = dma.vmem_to_hbm [thread:$0]  (%p1069_p3), %s438_s28, 128, %s435_s25, %s409_s29   ;;  %v390_v38 = vunpack.c.l.bf16 %v588_v36  ;;  %v391_v39 = vunpack.c.h.bf16 %v588_v36 }
 0x1dd   : > { %s204_s22 = scalar_lea.vmem [#allocation7], %s558_s18  ;;  %s421_s8 = scalar_lea.hbm %s1052_s2, %s590_s17 }
 0x1de   : > { %s423_s23 = sshll.u32 %s204_s22, 4  ;;  %s404_s25 = scalar_lea.sflag [#allocation4], %s975_s11  ;;  %s424_s23 = int_to_ptr.vmem [resolvable:$true] %s423_s23 }
 0x1df   : > { %s767_s28 = scalar_lea.vmem %s424_s23, 128  ;;  %s847_s29 = smov [#allocation7]  }
 0x1e0   : > { %p768_p11 = scmp.ne.s32.totalorder %s424_s23, %s767_s28  ;;  %s771_s7 = sshll.u32 %s847_s29, 4  ;;  %s772_s7 = int_to_ptr.vmem [resolvable:$false] %s771_s7 }
 0x1e1   : > { %s773_s18 = scalar_lea.vmem %s772_s7, 256  ;;  %p774_p2 = scmp.lt.s32.totalorder %s424_s23, %s772_s7 }
 0x1e2   : > { %p769_p7 = pnand %p768_p11, %p1069_p3  ;;  %p775_p13 = scmp.lt.s32.totalorder %s773_s18, %s767_s28 }
 0x1e4   : > { %p770_p10 = pneg %p769_p7  ;;  %p776_p0 = por %p775_p13, %p774_p2 }
 0x1e6   : > { %p777_p5 = pnand %p776_p0, %p770_p10 }
 0x259   : > { %v378_v37 = vpop.xlane.xlu0 %377 }
 0x25a   : > { %685 = vrcp.f32 %v378_v37 }
 0x267   : > { %v686_v40 = vpop.eup %685 }
 0x268   : > { %v392_v41 = vmul.f32 %v686_v40, %v390_v38  ;;  %v393_v42 = vmul.f32 %v686_v40, %v391_v39 }
 0x26a   : > { %v589_v43 = vpack.c.bf16 %v393_v42, %v392_v41 }
 0x26c   : > { %402 = vst [vmem:[%s204_s22] sm:$0xff] %v589_v43 }
 0x26d   : > { %780 = shalt.err (!%p777_p5)
}
 0x26e   : > { %s781_s16 = scalar_lea.hbm %s421_s8, 128  ;;  %s785_s9 = scalar_lea.hbm %s1052_s2, 256 }
 0x26f   : > { %p782_p9 = scmp.ne.s32.totalorder %s421_s8, %s781_s16  ;;  %p786_p4 = scmp.lt.s32.totalorder %s421_s8, %s1052_s2 }
 0x270   : > { %p787_p6 = scmp.lt.s32.totalorder %s785_s9, %s781_s16 }
 0x271   : > { %p783_p12 = pnand %p782_p9, %p1069_p3 }
 0x272   : > { %p788_p8 = por %p787_p6, %p786_p4 }
 0x273   : > { %p784_p1 = pneg %p783_p12 }
 0x275   : > { %p789_p11 = pnand %p788_p8, %p784_p1 }
 0x277   : > { %792 = shalt.err (!%p789_p11)
}
 0x278   : > { %598 = dma.vmem_to_hbm [thread:$0]  (%p1069_p3), %s424_s23, 128, %s421_s8, %s404_s25  }
 0x279 PF: > { %s449_s26 = sand.u32 1, %s827_s12   ;;  %p1070_p7 = scmp.ne.s32.totalorder %s1059_s19, 0 }
 0x27a   : > { %p1071_p10 = scmp.ge.s32.totalorder %s839_s15, 2  ;;  %s450_s27 = scalar_lea.sflag [#allocation4], %s449_s26 }
 0x27c   : > { %p611_p2 = pnand %p1071_p10, %p1070_p7 }
 0x27e   : > { %p612_p13 = pneg %p611_p2 }
 0x280   : > { %818 = dma.done.wait (%p612_p13), %s450_s27, 128  }
 0x281   : > { %820 = vsyncadd (%p612_p13), %s450_s27, 4294967168  ;;  %s459_s20 = scalar_lea.sflag [#allocation9], %s449_s26 }
 0x282   : > { %822 = dma.done.wait (%p612_p13), %s459_s20, 128  }
 0x283   : > { %824 = vsyncadd (%p612_p13), %s459_s20, 4294967168  ;;  %p21_p3 = scmp.ge.s32.totalorder %s922_s24, 4   ;;  %s1072_s12 = smov %s831_s13 }
 0x284   : > { %s1073_s13 = smov %s835_s14  ;;  %s1074_s14 = smov %s939_s5 }
 0x285   : > { %s1075_s15 = smov %s922_s24  ;;  %23 = sbr.rel (!%p21_p3) target bundleno = 8 (0x8), region = 94 }
 0x28a   :  { %464 = vsyncpa [#allocation3], 1 }
 0x28b   :  { %466 = vsyncpa [#allocation3 + $0x1], 1 }
 0x28c   :  { %467 = vsyncpa [#allocation6], 1 }
 0x28d   :  { %468 = vsyncpa [#allocation4], 1 }
 0x28e   :  { %470 = vsyncpa [#allocation4 + $0x1], 1 }
 0x28f   :  { %471 = vsyncpa [#allocation9], 1 }
 0x290   :  { %473 = vsyncpa [#allocation9 + $0x1], 1 }

</bundles_post_ra>
